<compile_context>
chip_gen: v6e
topology: v6e:2x2x1
jax: 0.10.0
libtpu: 0.0.40
codegen_flags: <defaults>
</compile_context>

<pallas_src>
import functools

import jax
import jax.numpy as jnp
import numpy as np
from jax.experimental import pallas as pl
from jax.experimental.pallas import tpu as pltpu

# ---- problem sizes (small, consistent with DDPGAgent defaults) ----
BATCH = 8
STATE_DIM = 16
ACTION_DIM = 4
HIDDEN = 128                 # p_hidden_sizes = [128, 128]
OUT_PAD = 128                # lane-dense output head (>= ACTION_DIM, multiple of 128)
ACTION_MIN, ACTION_MAX = -1.0, 1.0
LOC = (ACTION_MIN + ACTION_MAX) / 2.0        # 0.0
SCALE = (ACTION_MIN - ACTION_MAX) / 2.0      # -1.0 (matches the PyTorch code exactly)
EPS_EXPLORE = 0.3
BN_EPS = 1e-5

assert HIDDEN == OUT_PAD == 128, "bias packing below assumes HIDDEN == OUT_PAD == 128"


def ddpg_actor_kernel(x_ref, w1_ref, w2_ref, w3_ref, bias_ref, act_ref):
    """x_ref: [tb, STATE_DIM] f32; w*_ref: bf16 (BN pre-folded); bias_ref: [3, 128] f32."""
    x = x_ref[...].astype(jnp.bfloat16)
    b1 = bias_ref[0:1, :]            # [1, HIDDEN]  (folded BN1)
    b2 = bias_ref[1:2, :]            # [1, HIDDEN]  (folded BN2)
    b3 = bias_ref[2:3, :]            # [1, OUT_PAD] (zero-padded head bias)

    # Linear1 (+ folded BN1) -> ReLU      bf16 MXU inputs, f32 accumulate/elementwise
    h = jnp.dot(x, w1_ref[...], preferred_element_type=jnp.float32) + b1
    h = jnp.maximum(h, 0.0)

    # Linear2 (+ folded BN2) -> ReLU
    h = jnp.dot(h.astype(jnp.bfloat16), w2_ref[...],
                preferred_element_type=jnp.float32) + b2
    h = jnp.maximum(h, 0.0)

    # Linear3 (output head, lane-padded to 128)
    o = jnp.dot(h.astype(jnp.bfloat16), w3_ref[...],
                preferred_element_type=jnp.float32) + b3

    # actor squash: scale * tanh(o) + loc
    act_ref[...] = SCALE * jnp.tanh(o) + LOC


def _round_up(n, m):
    return ((n + m - 1) // m) * m


def fold_params(params):
    """Fold eval-mode BatchNorm into the Linear weights/biases, pad + pack for the kernel."""
    (w1, b1, g1, be1, m1, v1,
     w2, b2, g2, be2, m2, v2,
     w3, b3) = params

    s1 = g1 * jax.lax.rsqrt(v1 + BN_EPS)                 # [1, HIDDEN]
    s2 = g2 * jax.lax.rsqrt(v2 + BN_EPS)
    w1f = (w1 * s1).astype(jnp.bfloat16)                  # [STATE_DIM, HIDDEN]
    b1f = (b1 - m1) * s1 + be1                            # [1, HIDDEN] f32
    w2f = (w2 * s2).astype(jnp.bfloat16)                  # [HIDDEN, HIDDEN]
    b2f = (b2 - m2) * s2 + be2

    # lane-dense output head: zero-pad ACTION_DIM -> OUT_PAD on the out axis
    w3p = jnp.zeros((HIDDEN, OUT_PAD), jnp.float32).at[:, :ACTION_DIM].set(w3)
    w3p = w3p.astype(jnp.bfloat16)
    b3p = jnp.zeros((1, OUT_PAD), jnp.float32).at[:, :ACTION_DIM].set(b3)

    bias_pack = jnp.concatenate([b1f, b2f, b3p], axis=0)  # [3, 128] f32
    return w1f, w2f, w3p, bias_pack


@functools.partial(jax.jit, static_argnames=("tb",))
def ddpg_forward(x, noise, params, tb=128):
    """x: [B, STATE_DIM] f32, noise: [B, ACTION_DIM] f32 -> (act, act_exp)."""
    w1f, w2f, w3p, bias_pack = fold_params(params)

    B = x.shape[0]
    tb_eff = min(tb, _round_up(B, 8))          # batch tile (multiple of 8 sublanes)
    Bp = _round_up(B, tb_eff)
    xp = jnp.pad(x, ((0, Bp - B), (0, 0)))

    act_pad = pl.pallas_call(
        ddpg_actor_kernel,
        out_shape=jax.ShapeDtypeStruct((Bp, OUT_PAD), jnp.float32),
        grid_spec=pltpu.PrefetchScalarGridSpec(
            num_scalar_prefetch=0,
            grid=(Bp // tb_eff,),
            in_specs=[
                pl.BlockSpec((tb_eff, STATE_DIM), lambda i: (i, 0)),   # x tile
                pl.BlockSpec((STATE_DIM, HIDDEN), lambda i: (0, 0)),   # w1 (resident)
                pl.BlockSpec((HIDDEN, HIDDEN), lambda i: (0, 0)),      # w2 (resident)
                pl.BlockSpec((HIDDEN, OUT_PAD), lambda i: (0, 0)),     # w3 (resident)
                pl.BlockSpec((3, OUT_PAD), lambda i: (0, 0)),          # packed biases
            ],
            out_specs=pl.BlockSpec((tb_eff, OUT_PAD), lambda i: (i, 0)),
        ),
        compiler_params=pltpu.CompilerParams(
            dimension_semantics=("parallel",)),
    )(xp, w1f, w2f, w3p, bias_pack)

    act = act_pad[:B, :ACTION_DIM]
    # exploration noise added in the wrapper (fused by XLA); exact torch.randn
    # stream cannot be reproduced anyway.
    act_exp = act + EPS_EXPLORE * noise
    return act, act_exp


def init_params(key):
    """Mirror nn.Linear default init (U(-1/sqrt(fan_in), ..)) and nn.BatchNorm1d
    defaults (weight=1, bias=0, running_mean=0, running_var=1), eval mode."""
    def linear(k, fan_in, fan_out):
        kw, kb = jax.random.split(k)
        bound = 1.0 / np.sqrt(fan_in)
        w = jax.random.uniform(kw, (fan_in, fan_out), jnp.float32, -bound, bound)
        b = jax.random.uniform(kb, (1, fan_out), jnp.float32, -bound, bound)
        return w, b

    k1, k2, k3 = jax.random.split(key, 3)
    w1, b1 = linear(k1, STATE_DIM, HIDDEN)
    w2, b2 = linear(k2, HIDDEN, HIDDEN)
    w3, b3 = linear(k3, HIDDEN, ACTION_DIM)

    ones = jnp.ones((1, HIDDEN), jnp.float32)
    zeros = jnp.zeros((1, HIDDEN), jnp.float32)
    g1, be1, m1, v1 = ones, zeros, zeros, ones
    g2, be2, m2, v2 = ones, zeros, zeros, ones

    return (w1, b1, g1, be1, m1, v1,
            w2, b2, g2, be2, m2, v2,
            w3, b3)


def reference_forward(x, noise, params):
    """Pure-JAX f32 reference matching the PyTorch module math exactly."""
    (w1, b1, g1, be1, m1, v1,
     w2, b2, g2, be2, m2, v2,
     w3, b3) = params
    h = x @ w1 + b1
    h = (h - m1) / jnp.sqrt(v1 + BN_EPS) * g1 + be1
    h = jnp.maximum(h, 0.0)
    h = h @ w2 + b2
    h = (h - m2) / jnp.sqrt(v2 + BN_EPS) * g2 + be2
    h = jnp.maximum(h, 0.0)
    o = h @ w3 + b3
    a = SCALE * jnp.tanh(o) + LOC
    return a, a + EPS_EXPLORE * noise


if __name__ == "__main__":
    key = jax.random.PRNGKey(0)
    kx, knoise, kparams = jax.random.split(key, 3)

    x = jax.random.normal(kx, (BATCH, STATE_DIM), jnp.float32)
    noise = jax.random.normal(knoise, (BATCH, ACTION_DIM), jnp.float32)
    params = init_params(kparams)

    act, act_exp = ddpg_forward(x, noise, params)
    act = jax.block_until_ready(act)
    act_exp = jax.block_until_ready(act_exp)

    # sanity check against the f32 reference (bf16 MXU inputs -> relaxed tolerance)
    act_ref, act_exp_ref = reference_forward(x, noise, params)
    np.testing.assert_allclose(np.asarray(act), np.asarray(act_ref),
                               rtol=2e-2, atol=2e-2)
    np.testing.assert_allclose(np.asarray(act_exp), np.asarray(act_exp_ref),
                               rtol=2e-2, atol=2e-2)

    # TODO(synk): training-mode BatchNorm (batch statistics) is not implemented;
    # the kernel matches forward() with policy.eval(), as in the PyTorch module.
    print("KERNEL_OK")
</pallas_src>

<mosaic_0001>
module attributes {stable_mosaic.version = 11 : i64} {
  func.func @ddpg_actor_kernel(%arg0: i32, %arg1: memref<8x16xf32, #tpu.memory_space<vmem>>, %arg2: memref<16x128xbf16, #tpu.memory_space<vmem>>, %arg3: memref<128x128xbf16, #tpu.memory_space<vmem>>, %arg4: memref<128x128xbf16, #tpu.memory_space<vmem>>, %arg5: memref<3x128xf32, #tpu.memory_space<vmem>>, %arg6: memref<8x128xf32, #tpu.memory_space<vmem>>) attributes {dimension_semantics = [#tpu.dimension_semantics<parallel>], iteration_bounds = array<i64: 1>, scalar_prefetch = 0 : i64, scratch_operands = 0 : i64, tpu.core_type = #tpu.core_type<tc>, window_params = [{transform_indices = @transform_0, window_bounds = array<i64: 8, 16>}, {pipeline_mode = #tpu.pipeline_mode<synchronous>, transform_indices = @transform_1, window_bounds = array<i64: 16, 128>}, {pipeline_mode = #tpu.pipeline_mode<synchronous>, transform_indices = @transform_2, window_bounds = array<i64: 128, 128>}, {pipeline_mode = #tpu.pipeline_mode<synchronous>, transform_indices = @transform_3, window_bounds = array<i64: 128, 128>}, {pipeline_mode = #tpu.pipeline_mode<synchronous>, transform_indices = @transform_4, window_bounds = array<i64: 3, 128>}, {transform_indices = @transform_5, window_bounds = array<i64: 8, 128>}]} {
    %c0 = arith.constant 0 : index
    %c0_0 = arith.constant 0 : index
    %0 = vector.load %arg1[%c0, %c0_0] : memref<8x16xf32, #tpu.memory_space<vmem>>, vector<8x16xf32>
    %1 = arith.truncf %0 : vector<8x16xf32> to vector<8x16xbf16>
    %c0_1 = arith.constant 0 : index
    %c0_2 = arith.constant 0 : index
    %2 = vector.load %arg5[%c0_1, %c0_2] : memref<3x128xf32, #tpu.memory_space<vmem>>, vector<1x128xf32>
    %c1 = arith.constant 1 : index
    %c0_3 = arith.constant 0 : index
    %3 = vector.load %arg5[%c1, %c0_3] : memref<3x128xf32, #tpu.memory_space<vmem>>, vector<1x128xf32>
    %c2 = arith.constant 2 : index
    %c0_4 = arith.constant 0 : index
    %4 = vector.load %arg5[%c2, %c0_4] : memref<3x128xf32, #tpu.memory_space<vmem>>, vector<1x128xf32>
    %c0_5 = arith.constant 0 : index
    %c0_6 = arith.constant 0 : index
    %5 = vector.load %arg2[%c0_5, %c0_6] : memref<16x128xbf16, #tpu.memory_space<vmem>>, vector<16x128xbf16>
    %cst = arith.constant dense<0.000000e+00> : vector<8x128xf32>
    %6 = tpu.matmul %1, %5, %cst {dimension_numbers = #tpu.dot_dimension_numbers<[1], [0], [0], [1], [0, 0, 1, 1], [], []>} : vector<8x16xbf16>, vector<16x128xbf16>, vector<8x128xf32> -> vector<8x128xf32>
    %7 = vector.broadcast %2 : vector<1x128xf32> to vector<8x128xf32>
    %8 = arith.addf %6, %7 : vector<8x128xf32>
    %cst_7 = arith.constant 0.000000e+00 : f32
    %9 = vector.broadcast %cst_7 : f32 to vector<8x128xf32>
    %10 = arith.maximumf %8, %9 : vector<8x128xf32>
    %11 = arith.truncf %10 : vector<8x128xf32> to vector<8x128xbf16>
    %c0_8 = arith.constant 0 : index
    %c0_9 = arith.constant 0 : index
    %12 = vector.load %arg3[%c0_8, %c0_9] : memref<128x128xbf16, #tpu.memory_space<vmem>>, vector<128x128xbf16>
    %cst_10 = arith.constant dense<0.000000e+00> : vector<8x128xf32>
    %13 = tpu.matmul %11, %12, %cst_10 {dimension_numbers = #tpu.dot_dimension_numbers<[1], [0], [0], [1], [0, 0, 1, 1], [], []>} : vector<8x128xbf16>, vector<128x128xbf16>, vector<8x128xf32> -> vector<8x128xf32>
    %14 = vector.broadcast %3 : vector<1x128xf32> to vector<8x128xf32>
    %15 = arith.addf %13, %14 : vector<8x128xf32>
    %cst_11 = arith.constant 0.000000e+00 : f32
    %16 = vector.broadcast %cst_11 : f32 to vector<8x128xf32>
    %17 = arith.maximumf %15, %16 : vector<8x128xf32>
    %18 = arith.truncf %17 : vector<8x128xf32> to vector<8x128xbf16>
    %c0_12 = arith.constant 0 : index
    %c0_13 = arith.constant 0 : index
    %19 = vector.load %arg4[%c0_12, %c0_13] : memref<128x128xbf16, #tpu.memory_space<vmem>>, vector<128x128xbf16>
    %cst_14 = arith.constant dense<0.000000e+00> : vector<8x128xf32>
    %20 = tpu.matmul %18, %19, %cst_14 {dimension_numbers = #tpu.dot_dimension_numbers<[1], [0], [0], [1], [0, 0, 1, 1], [], []>} : vector<8x128xbf16>, vector<128x128xbf16>, vector<8x128xf32> -> vector<8x128xf32>
    %21 = vector.broadcast %4 : vector<1x128xf32> to vector<8x128xf32>
    %22 = arith.addf %20, %21 : vector<8x128xf32>
    %23 = math.tanh %22 : vector<8x128xf32>
    %cst_15 = arith.constant -1.000000e+00 : f32
    %24 = vector.broadcast %cst_15 : f32 to vector<8x128xf32>
    %25 = arith.mulf %24, %23 : vector<8x128xf32>
    %cst_16 = arith.constant 0.000000e+00 : f32
    %26 = vector.broadcast %cst_16 : f32 to vector<8x128xf32>
    %27 = arith.addf %25, %26 : vector<8x128xf32>
    %c0_17 = arith.constant 0 : index
    %c0_18 = arith.constant 0 : index
    %28 = vector.load %arg6[%c0_17, %c0_18] : memref<8x128xf32, #tpu.memory_space<vmem>>, vector<8x128xf32>
    tpu.vector_store %arg6[%c0_17, %c0_18], %27 {strides = array<i32>} : memref<8x128xf32, #tpu.memory_space<vmem>>, vector<8x128xf32>,
    return
  }
  func.func @transform_0(%arg0: i32) -> (i32, i32) {
    %c0_i32 = arith.constant 0 : i32
    %c0_i32_0 = arith.constant 0 : i32
    return %arg0, %c0_i32 : i32, i32
  }
  func.func @transform_1(%arg0: i32) -> (i32, i32) {
    %c0_i32 = arith.constant 0 : i32
    %c0_i32_0 = arith.constant 0 : i32
    %c0_i32_1 = arith.constant 0 : i32
    return %c0_i32, %c0_i32_0 : i32, i32
  }
  func.func @transform_2(%arg0: i32) -> (i32, i32) {
    %c0_i32 = arith.constant 0 : i32
    %c0_i32_0 = arith.constant 0 : i32
    %c0_i32_1 = arith.constant 0 : i32
    return %c0_i32, %c0_i32_0 : i32, i32
  }
  func.func @transform_3(%arg0: i32) -> (i32, i32) {
    %c0_i32 = arith.constant 0 : i32
    %c0_i32_0 = arith.constant 0 : i32
    %c0_i32_1 = arith.constant 0 : i32
    return %c0_i32, %c0_i32_0 : i32, i32
  }
  func.func @transform_4(%arg0: i32) -> (i32, i32) {
    %c0_i32 = arith.constant 0 : i32
    %c0_i32_0 = arith.constant 0 : i32
    %c0_i32_1 = arith.constant 0 : i32
    return %c0_i32, %c0_i32_0 : i32, i32
  }
  func.func @transform_5(%arg0: i32) -> (i32, i32) {
    %c0_i32 = arith.constant 0 : i32
    %c0_i32_0 = arith.constant 0 : i32
    return %arg0, %c0_i32 : i32, i32
  }
}

</mosaic_0001>

<bundles_post_ra>
// kernel: ddpg_forward.1
= control target key start
LH: loop header
LB: loop body
LE: loop exit
PB: predicated region body
PF: predicated region fallthrough
CT: control target
= control target key end

     0   :  { %v418_v0 = vmov 0.0   ;;  %vm419_vm0 = vmmov 0   ;;  %vm38_vm1 = vcmask 130048   ;;  %s536_s1 = inlined_call_operand.vmem [shape: bf16[16,128], index: 1, kind: input, shape index: {}]   ;;  %s537_s0 = inlined_call_operand.vmem [shape: f32[8,16], index: 0, kind: input, shape index: {}]   ;;  %s538_s2 = inlined_call_operand.vmem [shape: bf16[128,128], index: 2, kind: input, shape index: {}]   ;;  %s539_s3 = inlined_call_operand.vmem [shape: bf16[128,128], index: 3, kind: input, shape index: {}]   ;;  %s540_s4 = inlined_call_operand.vmem [shape: f32[3,128], index: 4, kind: input, shape index: {}]   ;;  %s541_s5 = inlined_call_operand.vmem [shape: f32[8,128], index: 5, kind: output, shape index: {}]  }
   0x1   :  { %351 = vmatprep.subr.bf16.mxu0 %v418_v0  ;;  %v399_v1 = vld [vmem:[%s536_s1] sm:$0xff]   ;;  %353 = vmatprep.mubr.msk.bf16.mxu0 %vm419_vm0, %v418_v0  ;;  %v400_v4 = vld [vmem:[%s538_s2 + $0x38] sm:$0xff]   ;;  %v401_v5 = vld [vmem:[%s538_s2 + $0x30] sm:$0xff]  }
   0x2   :  { %v21_v2 = vld [vmem:[%s537_s0] sm:$0xff]  ;;  %357 = vmatprep.subr.bf16.mxu1 %v418_v0  ;;  %373 = vmatprep.mubr.msk.bf16.mxu1 %vm419_vm0, %v418_v0  ;;  %v402_v6 = vld [vmem:[%s538_s2 + $0x28] sm:$0xff]   ;;  %v404_v8 = vld [vmem:[%s538_s2 + $0x18] sm:$0xff]  }
   0x3   :  { %352 = vmatpush3.bf16.msra.mxu0 %v399_v1  ;;  %v22_v3 = vpack.c.bf16 %v21_v2, %v21_v2  ;;  %358 = vmatpush3.bf16.msra.mxu1 %v400_v4  ;;  %v403_v7 = vld [vmem:[%s538_s2 + $0x20] sm:$0xff]   ;;  %v405_v9 = vld [vmem:[%s538_s2 + $0x10] sm:$0xff]   ;;  %v406_v10 = vld [vmem:[%s538_s2 + $0x8] sm:$0xff]  }
   0x4   :  { %377 = vmatprep.subr.bf16.mxu0 %v418_v0  ;;  %359 = vmatprep.subr.bf16.mxu1 %v418_v0  ;;  %v407_v11 = vld [vmem:[%s538_s2] sm:$0xff]   ;;  %v408_v12 = vld [vmem:[%s539_s3 + $0x38] sm:$0xff]   ;;  %v409_v13 = vld [vmem:[%s539_s3 + $0x30] sm:$0xff]  }
   0x5   :  { %v410_v14 = vld [vmem:[%s539_s3 + $0x28] sm:$0xff]   ;;  %v411_v15 = vld [vmem:[%s539_s3 + $0x20] sm:$0xff]   ;;  %v412_v16 = vld [vmem:[%s539_s3 + $0x18] sm:$0xff]  }
   0x6   :  { %354 = vmatmul.mubr.msk.bf16.vlgmr.msra.gmra.mxu0 %vm38_vm1, %v22_v3  ;;  %v413_v17 = vld [vmem:[%s539_s3 + $0x10] sm:$0xff]   ;;  %v310_v18 = vld [vmem:[%s540_s4] ss:$0 sm:$0xff]  ;;  %v414_v26 = vld [vmem:[%s539_s3 + $0x8] sm:$0xff]  }
   0x7   :  { %393 = vmatprep.mubr.msk.bf16.mxu0 %vm419_vm0, %v418_v0  ;;  %360 = vmatpush3.bf16.msra.mxu1 %v401_v5  ;;  %v415_v27 = vld [vmem:[%s539_s3] sm:$0xff]  }
   0x8   :  { %361 = vmatprep.subr.bf16.mxu1 %v418_v0  ;;  %378 = vmatpush3.bf16.msra.mxu0 %v408_v12  ;;  %v313_v28 = vld [vmem:[%s540_s4 + $0x1] ss:$0 sm:$0xff]  ;;  %v322_v36 = vld [vmem:[%s540_s4 + $0x2] ss:$0 sm:$0xff] }
   0x9   :  { %379 = vmatprep.subr.bf16.mxu0 %v418_v0 }
   0xb   :  { %362 = vmatpush3.bf16.msra.mxu1 %v402_v6 }
   0xc   :  { %363 = vmatprep.subr.bf16.mxu1 %v418_v0  ;;  %380 = vmatpush3.bf16.msra.mxu0 %v409_v13 }
   0xd   :  { %381 = vmatprep.subr.bf16.mxu0 %v418_v0 }
   0xf   :  { %364 = vmatpush3.bf16.msra.mxu1 %v403_v7 }
  0x10   :  { %365 = vmatprep.subr.bf16.mxu1 %v418_v0  ;;  %382 = vmatpush3.bf16.msra.mxu0 %v410_v14 }
  0x11   :  { %383 = vmatprep.subr.bf16.mxu0 %v418_v0 }
  0x13   :  { %366 = vmatpush3.bf16.msra.mxu1 %v404_v8 }
  0x14   :  { %367 = vmatprep.subr.bf16.mxu1 %v418_v0  ;;  %384 = vmatpush3.bf16.msra.mxu0 %v411_v15 }
  0x15   :  { %385 = vmatprep.subr.bf16.mxu0 %v418_v0 }
  0x17   :  { %368 = vmatpush3.bf16.msra.mxu1 %v405_v9 }
  0x18   :  { %369 = vmatprep.subr.bf16.mxu1 %v418_v0  ;;  %386 = vmatpush3.bf16.msra.mxu0 %v412_v16 }
  0x19   :  { %387 = vmatprep.subr.bf16.mxu0 %v418_v0 }
  0x1b   :  { %370 = vmatpush3.bf16.msra.mxu1 %v406_v10 }
  0x1c   :  { %371 = vmatprep.subr.bf16.mxu1 %v418_v0  ;;  %388 = vmatpush3.bf16.msra.mxu0 %v413_v17 }
  0x1d   :  { %389 = vmatprep.subr.bf16.mxu0 %v418_v0 }
  0x1f   :  { %372 = vmatpush3.bf16.msra.mxu1 %v407_v11 }
  0x20   :  { %390 = vmatpush3.bf16.msra.mxu0 %v414_v26 }
  0x21   :  { %391 = vmatprep.subr.bf16.mxu0 %v418_v0 }
  0x24   :  { %392 = vmatpush3.bf16.msra.mxu0 %v415_v27 }
  0xc6   :  { %v76_v19 = vpop.f32.mrf.mxu0 }
  0xc7   :  { %v77_v20 = vadd.f32 %v310_v18, %v76_v19 }
  0xc8   :  { %v355_v21 = vpop.f32.mrf.mxu0 }
  0xc9   :  { %v82_v22 = vmax.f32 %v77_v20, 0.0 }
  0xca   :  { %v79_v23 = vpop.f32.mrf.mxu0 }
  0xcb   :  { %v83_v24 = vpack.c.bf16 %v82_v22, %v82_v22 }
  0xcc   :  { %v356_v25 = vpop.f32.mrf.mxu0 }
  0xcd   :  { %374 = vmatmul.mubr.bf16.vlgmr.msra.gmra.mxu1 %v83_v24 }
 0x18d   :  { %v186_v29 = vpop.f32.mrf.mxu1 }
 0x18e   :  { %v187_v30 = vadd.f32 %v313_v28, %v186_v29 }
 0x18f   :  { %v375_v31 = vpop.f32.mrf.mxu1 }
 0x190   :  { %v192_v32 = vmax.f32 %v187_v30, 0.0 }
 0x191   :  { %v189_v33 = vpop.f32.mrf.mxu1 }
 0x192   :  { %v193_v34 = vpack.c.bf16 %v192_v32, %v192_v32 }
 0x193   :  { %v376_v35 = vpop.f32.mrf.mxu1 }
 0x194   :  { %394 = vmatmul.mubr.bf16.vlgmr.msra.gmra.mxu0 %v193_v34 }
 0x254   :  { %v296_v37 = vpop.f32.mrf.mxu0 }
 0x255   :  { %v297_v38 = vadd.f32 %v322_v36, %v296_v37 }
 0x256   :  { %v395_v39 = vpop.f32.mrf.mxu0 }
 0x257   :  { %416 = vtanh.f32 %v297_v38 }
 0x258   :  { %v299_v40 = vpop.f32.mrf.mxu0 }
 0x25a   :  { %v396_v41 = vpop.f32.mrf.mxu0 }
 0x264   :  { %v417_v42 = vpop.eup %416 }
 0x265   :  { %v303_v43 = vmul.f32 -1.0, %v417_v42 }
 0x267   :  { %305 = vst [vmem:[%s541_s5] sm:$0xff] %v303_v43 }

</bundles_post_ra>
